<compile_context>
chip_gen: v5e
topology: v5e:2x2
jax: 0.10.0
libtpu: 0.0.40
codegen_flags: <defaults>
</compile_context>

<pallas_src>
import functools

import jax
import jax.numpy as jnp
from jax.experimental import pallas as pl
from jax.experimental.pallas import tpu as pltpu


def make_positional_encoding(d_model: int, max_len: int = 512,
                             dtype=jnp.float32) -> jnp.ndarray:
    """Deterministic sinusoidal table, identical math to the PyTorch __init__.

    Store the table in the model dtype once at init (pass `dtype=`): the
    forward pass then never pays a per-call convert over the (1, max_len, D)
    table.  Returns pe of shape (1, max_len, d_model).
    """
    assert d_model % 2 == 0, "d_model must be even (same constraint as the PyTorch reference)"
    position = jnp.arange(0, max_len, dtype=jnp.float32)[:, None]            # (max_len, 1)
    div_term = jnp.exp(
        jnp.arange(0, d_model, 2, dtype=jnp.float32)
        * (-jnp.log(jnp.float32(10000.0)) / d_model)
    )                                                                         # (d_model//2,)
    angles = position * div_term                                              # (max_len, d_model//2)
    pe = jnp.zeros((max_len, d_model), dtype=jnp.float32)
    pe = pe.at[:, 0::2].set(jnp.sin(angles))
    pe = pe.at[:, 1::2].set(jnp.cos(angles))
    return pe[None, :, :].astype(dtype)                                       # (1, max_len, d_model)


def _add_kernel(x_ref, pe_ref, o_ref):
    # Identical block shapes for x and pe (batch dim squeezed / matched in the
    # BlockSpec): a straight VPU add, no broadcast_in_dim in the body.
    o_ref[...] = x_ref[...] + pe_ref[...]


# Aim for >= 4 total grid steps so dimension_semantics=("parallel","parallel")
# actually gives v7x's second TensorCore work even at B == 1.  Per-step
# overhead is ~0.35 us, negligible against the multi-us DMA per multi-MiB tile.
_MIN_GRID_STEPS = 4


@functools.lru_cache(maxsize=None)
def _vmem_budget():
    """(max_block_bytes, vmem_limit_bytes) sized per TPU generation.

    3 streams (x, pe, out) x 2 pipeline buffers per stream -> pipelined working
    set ~6x the block size plus Mosaic internal scratch:
      * 128 MiB VMEM chips (v5e/v6e): 6 MiB blocks, explicit 64 MiB scoped
        limit (v5e's 16 MiB *default* scoped VMEM would otherwise overflow).
      * 64 MiB VMEM chips (v7x) / unknown: 3 MiB blocks under a 32 MiB limit,
        leaving headroom instead of compiling at the edge of the default.
    """
    try:
        phys = int(pltpu.get_tpu_info().vmem_capacity_bytes)
    except Exception:  # not queryable (interpret mode / older jax) -> be conservative
        phys = 64 << 20
    if phys >= (128 << 20):
        return 6 << 20, 64 << 20
    return 3 << 20, 32 << 20


def _pick_tile(n: int, align: int, cap_elems: int, min_tiles: int = 1) -> int:
    """Largest multiple of `align` dividing n, <= cap, and (if possible) giving
    at least `min_tiles` tiles; falls back to the full extent (always legal)."""
    def search(req):
        t = (min(n, cap_elems) // align) * align
        while t >= align:
            if n % t == 0 and n // t >= req:
                return t
            t -= align
        return None

    t = search(min_tiles) or search(1)
    return t if t is not None else n


def _call_add(x3, pe3, ts, donate_x, vmem_limit):
    """Shared pallas_call for a (B, rows, lanes) layout tiled along `rows`.

    pe3 is (1, rows, lanes): its block index is constant over the inner batch
    axis, so each pe tile is DMA'd once per row-tile and reused across batch.
    """
    B, R, L = x3.shape
    grid = (R // ts, B)  # row-tile major, batch minor -> pe tile stays VMEM-resident
    alias = {"input_output_aliases": {0: 0}} if donate_x else {}
    return pl.pallas_call(
        _add_kernel,
        out_shape=jax.ShapeDtypeStruct((B, R, L), x3.dtype),
        grid_spec=pltpu.PrefetchScalarGridSpec(
            num_scalar_prefetch=0,
            grid=grid,
            in_specs=[
                pl.BlockSpec((pl.Squeezed(), ts, L), lambda r, b: (b, r, 0)),
                pl.BlockSpec((pl.Squeezed(), ts, L), lambda r, b: (0, r, 0)),
            ],
            out_specs=pl.BlockSpec((pl.Squeezed(), ts, L), lambda r, b: (b, r, 0)),
        ),
        compiler_params=pltpu.CompilerParams(
            dimension_semantics=("parallel", "parallel"),
            vmem_limit_bytes=vmem_limit,
        ),
        **alias,
    )(x3, pe3)


@functools.partial(jax.jit, static_argnames=("donate_x",))
def positional_encoding_forward(x: jnp.ndarray, pe: jnp.ndarray,
                                *, donate_x: bool = False) -> jnp.ndarray:
    """x: (B, S, D); pe: (1, max_len, D). Returns x + pe[:, :S].

    Set donate_x=True only when the caller donates x's buffer: it adds
    input_output_aliases={0: 0} so the output reuses x's HBM allocation.
    """
    B, S, D = x.shape
    max_len = pe.shape[1]
    assert S <= max_len, "sequence length exceeds positional-encoding table"

    # Table should already be stored in the model dtype (see
    # make_positional_encoding); this convert only traces when it isn't.
    if pe.dtype != x.dtype:
        pe = pe.astype(x.dtype)

    itemsize = x.dtype.itemsize
    max_block_bytes, vmem_limit = _vmem_budget()
    min_tiles = max(1, -(-_MIN_GRID_STEPS // B))  # ceil(_MIN_GRID_STEPS / B)

    if D % 128 == 0:
        # Already lane-dense: tile the sequence axis; pe is sliced straight out
        # of the full table by the index_map (no pe[:, :S] materialization).
        cap_rows = max(8, max_block_bytes // (D * itemsize))
        ts = _pick_tile(S, 8, cap_rows, min_tiles)
        return _call_add(x, pe, ts, donate_x, vmem_limit)

    if (S * D) % 128 == 0:
        # D not a multiple of 128 (e.g. D=32): view each batch row as a
        # lane-dense (rows, 128) slab so both sublanes and lanes are packed
        # (unmasked vst), instead of a (1, tf) block using 1 of 8 sublanes.
        R = (S * D) // 128
        x2 = x.reshape(B, R, 128)                   # contiguous -> free reshape
        pe2 = pe[:, :S, :].reshape(1, R, 128)       # tiny (S*D) slab, reused over batch
        cap_rows = max(8, max_block_bytes // (128 * itemsize))
        tr = _pick_tile(R, 8, cap_rows, min_tiles)
        out2 = _call_add(x2, pe2, tr, donate_x, vmem_limit)
        return out2.reshape(B, S, D)

    # Rare fallback (S*D not a multiple of 128): keep (B, S, D) with the full D
    # extent as the lane dim.  Correct; lanes past D are masked.
    cap_rows = max(8, max_block_bytes // (D * itemsize))
    ts = _pick_tile(S, 8, cap_rows, min_tiles)
    return _call_add(x, pe, ts, donate_x, vmem_limit)


if __name__ == "__main__":
    # Main test: small shapes consistent with the module (batch=2, seq=8, d_model=32).
    B, S, D = 2, 8, 32
    key = jax.random.PRNGKey(0)
    x = jax.random.normal(key, (B, S, D), dtype=jnp.float32)
    pe = make_positional_encoding(d_model=D, max_len=512)

    out = jax.block_until_ready(positional_encoding_forward(x, pe))
    ref = x + pe[:, :S, :]
    assert out.shape == (B, S, D)
    assert jnp.allclose(out, ref, atol=1e-6), "mismatch vs reference (flat lane-dense path)"

    # Also exercise the D % 128 == 0 sequence-tiled path.
    B2, S2, D2 = 2, 16, 128
    x_b = jax.random.normal(jax.random.PRNGKey(1), (B2, S2, D2), dtype=jnp.float32)
    pe_b = make_positional_encoding(d_model=D2, max_len=512)
    out_b = jax.block_until_ready(positional_encoding_forward(x_b, pe_b))
    ref_b = x_b + pe_b[:, :S2, :]
    assert jnp.allclose(out_b, ref_b, atol=1e-6), "mismatch vs reference (3D tiled path)"

    print("KERNEL_OK")
</pallas_src>

<mosaic_0001>
module attributes {stable_mosaic.version = 11 : i64} {
  func.func @_add_kernel(%arg0: i32, %arg1: i32, %arg2: memref<1x2x128xf32, #tpu.memory_space<vmem>>, %arg3: memref<1x2x128xf32, #tpu.memory_space<vmem>>, %arg4: memref<1x2x128xf32, #tpu.memory_space<vmem>>) attributes {dimension_semantics = [#tpu.dimension_semantics<parallel>, #tpu.dimension_semantics<parallel>], iteration_bounds = array<i64: 1, 2>, scalar_prefetch = 0 : i64, scratch_operands = 0 : i64, tpu.core_type = #tpu.core_type<tc>, window_params = [{transform_indices = @transform_0, window_bounds = array<i64: 1, 2, 128>}, {transform_indices = @transform_1, window_bounds = array<i64: 1, 2, 128>}, {transform_indices = @transform_2, window_bounds = array<i64: 1, 2, 128>}]} {
    %c0 = arith.constant 0 : index
    %c0_0 = arith.constant 0 : index
    %c0_1 = arith.constant 0 : index
    %0 = vector.load %arg2[%c0, %c0_0, %c0_1] : memref<1x2x128xf32, #tpu.memory_space<vmem>>, vector<1x2x128xf32>
    %1 = vector.shape_cast %0 : vector<1x2x128xf32> to vector<2x128xf32>
    %c0_2 = arith.constant 0 : index
    %c0_3 = arith.constant 0 : index
    %c0_4 = arith.constant 0 : index
    %2 = vector.load %arg3[%c0_2, %c0_3, %c0_4] : memref<1x2x128xf32, #tpu.memory_space<vmem>>, vector<1x2x128xf32>
    %3 = vector.shape_cast %2 : vector<1x2x128xf32> to vector<2x128xf32>
    %4 = arith.addf %1, %3 : vector<2x128xf32>
    %c0_5 = arith.constant 0 : index
    %c0_6 = arith.constant 0 : index
    %c0_7 = arith.constant 0 : index
    %5 = vector.load %arg4[%c0_5, %c0_6, %c0_7] : memref<1x2x128xf32, #tpu.memory_space<vmem>>, vector<1x2x128xf32>
    %6 = vector.shape_cast %5 : vector<1x2x128xf32> to vector<2x128xf32>
    %7 = vector.shape_cast %4 : vector<2x128xf32> to vector<1x2x128xf32>
    tpu.vector_store %arg4[%c0_5, %c0_6, %c0_7], %7 {strides = array<i32>} : memref<1x2x128xf32, #tpu.memory_space<vmem>>, vector<1x2x128xf32>,
    return
  }
  func.func @transform_0(%arg0: i32, %arg1: i32) -> (i32, i32, i32) {
    %c0_i32 = arith.constant 0 : i32
    %c0_i32_0 = arith.constant 0 : i32
    return %arg1, %arg0, %c0_i32 : i32, i32, i32
  }
  func.func @transform_1(%arg0: i32, %arg1: i32) -> (i32, i32, i32) {
    %c0_i32 = arith.constant 0 : i32
    %c0_i32_0 = arith.constant 0 : i32
    %c0_i32_1 = arith.constant 0 : i32
    return %c0_i32, %arg0, %c0_i32_0 : i32, i32, i32
  }
  func.func @transform_2(%arg0: i32, %arg1: i32) -> (i32, i32, i32) {
    %c0_i32 = arith.constant 0 : i32
    %c0_i32_0 = arith.constant 0 : i32
    return %arg1, %arg0, %c0_i32 : i32, i32, i32
  }
}

</mosaic_0001>

<bundles_post_ra>
// kernel: positional_encoding_forward.1
= control target key start
LH: loop header
LB: loop body
LE: loop exit
PB: predicated region body
PF: predicated region fallthrough
CT: control target
= control target key end

     0   :  { %s354_s9 = smov 0   ;;  %s331_s10 = smov 0   ;;  %s368_s0 = inlined_call_operand.vmem [shape: f32[2,2,128], index: 0, kind: input, shape index: {}]   ;;  %s369_s1 = inlined_call_operand.vmem [shape: f32[1,2,128], index: 1, kind: input, shape index: {}]   ;;  %s370_s2 = inlined_call_operand.vmem [shape: f32[2,2,128], index: 2, kind: output, shape index: {}]  }
   0x1   :  { %s335_s11 = smov 0  }
   0x2 LB: > { %s21_s12 = sadd.s32 1, %s333_s10  ;;  %p286_p0 = scmp.ge.s32.totalorder %s337_s11, 1  ;;  %s337_s11 = sphi %s335_s11, %s12_s11   ;;  %s333_s10 = sphi %s331_s10, %s332_s10   ;;  %s329_s9 = sphi %s354_s9, %s371_s9  }
   0x3   : > { %p22_p1 = scmp.ge.s32.totalorder %s21_s12, 2  ;;  %p139_p2 = scmp.lt.s32.totalorder %s337_s11, 3 }
   0x5   : > { %s373_s12 = smov (%p22_p1, %s21_s12), 0  ;;  %p140_p3 = pnand %p286_p0, %p139_p2 }
   0x6   : > { %p169_p4 = scmp.lt.s32.totalorder (!%p140_p3), %s329_s9, 1 }
   0x7   : > { %143 = sbr.rel (%p140_p3) target bundleno = 19 (0x13), region = 28 }
   0xc   : > { %s375_s9 = smov (!%p169_p4, %s329_s9), 1  ;;  %v188_v0 = vld [vmem:[%s369_s1] sm:$0x3] }
   0xd   : > { %s287_s13 = sshll.u32 %s375_s9, 1 }
   0xe   : > { %s175_s18 = scalar_lea.vmem %s368_s0, %s287_s13  ;;  %s186_s21 = scalar_lea.vmem %s370_s2, %s287_s13 }
   0xf   : > { %v187_v1 = vld [vmem:[%s175_s18] sm:$0x3] }
  0x10   : > { %v189_v2 = vadd.f32 %v188_v0, %v187_v1 }
  0x12   : > { %190 = vst [vmem:[%s186_s21] sm:$0x3] %v189_v2 }
  0x13 PF: > { %s12_s11 = sadd.s32 1, %s337_s11   ;;  %s371_s9 = smov %s333_s10 }
  0x14   : > { %p9_p5 = scmp.ge.s32.totalorder %s12_s11, 4   ;;  %s332_s10 = smov %s373_s12  }
  0x16   :  { %11 = sbr.rel (!%p9_p5) target bundleno = 2 (0x2), region = 61 }

</bundles_post_ra>
